<compile_context>
chip_gen: v6e
topology: v6e:2x2x1
jax: 0.10.0
libtpu: 0.0.40
codegen_flags: <defaults>
</compile_context>

<pallas_src>
import functools

import jax
import jax.numpy as jnp
from jax.experimental import pallas as pl
from jax.experimental.pallas import tpu as pltpu

EEG_DIM = 32
FACE_DIM = 768
HIDDEN = 128
OUT_DIM = 2
OUT_PAD = 128          # lane-dense logits slab; real logits are [:, :OUT_DIM]
BN_EPS = 1e-5


def _classifier_kernel(
    # batch-tiled activations (original dtype, cast in-kernel)
    eeg_ref, face_ref,
    # eeg encoder (BN folded into the Linears)
    we1_ref, be1_ref, we2_ref, be2_ref,
    # face encoder (BN folded into the Linears)
    wf1_ref, bf1_ref, wf2_ref, bf2_ref,
    # fusion: split first Linear (no concat scratch) + lane-padded head
    wu1e_ref, wu1f_ref, bu1_ref, wu2_ref, bu2_ref,
    # outputs
    logits_ref, eeg_feat_ref, face_feat_ref,
):
    # ---- EEG encoder: (Linear+BN) -> ReLU -> (Linear+BN) -> ReLU ----
    eeg = eeg_ref[...].astype(jnp.bfloat16)
    h = jnp.dot(eeg, we1_ref[...], preferred_element_type=jnp.float32) + be1_ref[...]
    h = jnp.maximum(h, 0.0).astype(jnp.bfloat16)
    h = jnp.dot(h, we2_ref[...], preferred_element_type=jnp.float32) + be2_ref[...]
    eeg_feat = jnp.maximum(h, 0.0)                       # f32
    eeg_feat_ref[...] = eeg_feat.astype(eeg_feat_ref.dtype)   # writeback early
    eeg_feat_b = eeg_feat.astype(jnp.bfloat16)           # only bf16 stays live

    # ---- Face encoder ----
    face = face_ref[...].astype(jnp.bfloat16)
    g = jnp.dot(face, wf1_ref[...], preferred_element_type=jnp.float32) + bf1_ref[...]
    g = jnp.maximum(g, 0.0).astype(jnp.bfloat16)
    g = jnp.dot(g, wf2_ref[...], preferred_element_type=jnp.float32) + bf2_ref[...]
    face_feat = jnp.maximum(g, 0.0)                      # f32
    face_feat_ref[...] = face_feat.astype(face_feat_ref.dtype)
    face_feat_b = face_feat.astype(jnp.bfloat16)

    # ---- Fusion: two K=128 MXU passes replace concat + K=256 pass ----
    fused = (
        jnp.dot(eeg_feat_b, wu1e_ref[...], preferred_element_type=jnp.float32)
        + jnp.dot(face_feat_b, wu1f_ref[...], preferred_element_type=jnp.float32)
        + bu1_ref[...]
    )
    fused = jnp.maximum(fused, 0.0).astype(jnp.bfloat16)

    # Lane-dense (tb, 128) logits slab; columns >= OUT_DIM are zero-padded.
    logits = jnp.dot(fused, wu2_ref[...], preferred_element_type=jnp.float32) + bu2_ref[...]
    logits_ref[...] = logits.astype(logits_ref.dtype)


def _linear_params(key, fan_in, fan_out):
    """Deterministic init matching nn.Linear uniform(-1/sqrt(fan_in), 1/sqrt(fan_in))."""
    kw, kb = jax.random.split(key)
    bound = 1.0 / (fan_in ** 0.5)
    w = jax.random.uniform(kw, (fan_in, fan_out), jnp.float32, -bound, bound)  # (in, out)
    b = jax.random.uniform(kb, (1, fan_out), jnp.float32, -bound, bound)
    return w, b


def _bn_affine(fan_out):
    """BatchNorm1d eval affine from (gamma, beta, running_mean, running_var)."""
    gamma = jnp.ones((1, fan_out), jnp.float32)
    beta = jnp.zeros((1, fan_out), jnp.float32)
    running_mean = jnp.zeros((1, fan_out), jnp.float32)
    running_var = jnp.ones((1, fan_out), jnp.float32)
    scale = gamma / jnp.sqrt(running_var + BN_EPS)
    shift = beta - running_mean * scale
    return scale, shift


def _fold_bn(w, b, scale, shift):
    """Fold BN(xW + b) = x(W*scale) + (b*scale + shift) into the Linear."""
    return w * scale, b * scale + shift


def init_params(key):
    keys = jax.random.split(key, 6)
    we1, be1 = _fold_bn(*_linear_params(keys[0], EEG_DIM, HIDDEN), *_bn_affine(HIDDEN))
    we2, be2 = _fold_bn(*_linear_params(keys[1], HIDDEN, HIDDEN), *_bn_affine(HIDDEN))
    wf1, bf1 = _fold_bn(*_linear_params(keys[2], FACE_DIM, HIDDEN), *_bn_affine(HIDDEN))
    wf2, bf2 = _fold_bn(*_linear_params(keys[3], HIDDEN, HIDDEN), *_bn_affine(HIDDEN))
    wu1, bu1 = _linear_params(keys[4], 2 * HIDDEN, HIDDEN)
    wu2, bu2 = _linear_params(keys[5], HIDDEN, OUT_DIM)

    # Split the fusion weight so the kernel never materializes the concat.
    wu1e, wu1f = wu1[:HIDDEN], wu1[HIDDEN:]

    # Lane-dense head: zero-pad the 2 output columns to 128.
    wu2p = jnp.zeros((HIDDEN, OUT_PAD), jnp.float32).at[:, :OUT_DIM].set(wu2)
    bu2p = jnp.zeros((1, OUT_PAD), jnp.float32).at[:, :OUT_DIM].set(bu2)

    bf16 = lambda x: x.astype(jnp.bfloat16)
    return dict(
        we1=bf16(we1), be1=be1, we2=bf16(we2), be2=be2,
        wf1=bf16(wf1), bf1=bf1, wf2=bf16(wf2), bf2=bf2,
        wu1e=bf16(wu1e), wu1f=bf16(wu1f), bu1=bu1,
        wu2=bf16(wu2p), bu2=bu2p,
    )


def _round_up(x, m):
    return (x + m - 1) // m * m


def _vmem_limit_bytes(tb, params):
    """Double-buffered streams + resident params + headroom for live intermediates."""
    in_bytes = tb * (EEG_DIM + FACE_DIM) * 4                 # f32 inputs
    out_bytes = tb * (OUT_PAD + 2 * HIDDEN) * 4              # f32 outputs
    stream = 2 * (in_bytes + out_bytes)                      # double-buffered
    weights = 2 * sum(int(p.size) * p.dtype.itemsize for p in params.values())
    temps = 8 * tb * HIDDEN * 4                              # live (tb,128) intermediates
    return int(stream + weights + temps) + (4 << 20)


@functools.partial(jax.jit, static_argnames=("tile_b",))
def simple_emotion_classifier(eeg, face, params, tile_b=2048):
    batch = eeg.shape[0]
    # Sublane-aligned tile; cap so large batches keep >=2 grid tiles (v7x megacore).
    tb = max(8, min(tile_b, _round_up(pl.cdiv(batch, 2), 8)))
    grid = (pl.cdiv(batch, tb),)

    def act_spec(dim):
        return pl.BlockSpec((tb, dim), lambda b: (b, 0))

    def const_spec(p):
        return pl.BlockSpec(p.shape, lambda b: (0, 0))   # resident across all batch tiles

    ordered = [
        eeg, face,
        params["we1"], params["be1"], params["we2"], params["be2"],
        params["wf1"], params["bf1"], params["wf2"], params["bf2"],
        params["wu1e"], params["wu1f"], params["bu1"], params["wu2"], params["bu2"],
    ]
    in_specs = [act_spec(EEG_DIM), act_spec(FACE_DIM)] + [const_spec(p) for p in ordered[2:]]

    logits_p, eeg_feat, face_feat = pl.pallas_call(
        _classifier_kernel,
        grid=grid,
        out_shape=(
            jax.ShapeDtypeStruct((batch, OUT_PAD), jnp.float32),
            jax.ShapeDtypeStruct((batch, HIDDEN), jnp.float32),
            jax.ShapeDtypeStruct((batch, HIDDEN), jnp.float32),
        ),
        in_specs=in_specs,
        out_specs=(act_spec(OUT_PAD), act_spec(HIDDEN), act_spec(HIDDEN)),
        compiler_params=pltpu.CompilerParams(
            dimension_semantics=("parallel",),
            vmem_limit_bytes=_vmem_limit_bytes(tb, params),
        ),
    )(*ordered)

    return logits_p[:, :OUT_DIM], eeg_feat, face_feat


def _reference(eeg, face, p):
    """Pure-JAX reference with the same bf16-weight / f32-accumulate numerics."""
    f32 = lambda x: x.astype(jnp.float32)
    eeg = f32(eeg.astype(jnp.bfloat16))
    face = f32(face.astype(jnp.bfloat16))

    def enc(x, w1, b1, w2, b2):
        h = jnp.maximum(x @ f32(w1) + b1, 0.0)
        h = f32(h.astype(jnp.bfloat16))
        return jnp.maximum(h @ f32(w2) + b2, 0.0)

    ef = enc(eeg, p["we1"], p["be1"], p["we2"], p["be2"])
    ff = enc(face, p["wf1"], p["bf1"], p["wf2"], p["bf2"])
    ef_b = f32(ef.astype(jnp.bfloat16))
    ff_b = f32(ff.astype(jnp.bfloat16))
    fused = jnp.maximum(ef_b @ f32(p["wu1e"]) + ff_b @ f32(p["wu1f"]) + p["bu1"], 0.0)
    fused = f32(fused.astype(jnp.bfloat16))
    logits = fused @ f32(p["wu2"]) + p["bu2"]
    return logits[:, :OUT_DIM], ef, ff


if __name__ == "__main__":
    key = jax.random.PRNGKey(0)
    k_eeg, k_face, k_params = jax.random.split(key, 3)

    batch = 8
    eeg = jax.random.normal(k_eeg, (batch, EEG_DIM), jnp.float32)
    face = jax.random.normal(k_face, (batch, FACE_DIM), jnp.float32)
    params = init_params(k_params)

    logits, eeg_feat, face_feat = simple_emotion_classifier(eeg, face, params)
    jax.block_until_ready((logits, eeg_feat, face_feat))

    ref_logits, ref_ef, ref_ff = _reference(eeg, face, params)
    assert logits.shape == (batch, OUT_DIM)
    assert eeg_feat.shape == (batch, HIDDEN) and face_feat.shape == (batch, HIDDEN)
    assert jnp.allclose(logits, ref_logits, atol=1e-2, rtol=1e-2)
    assert jnp.allclose(eeg_feat, ref_ef, atol=1e-2, rtol=1e-2)
    assert jnp.allclose(face_feat, ref_ff, atol=1e-2, rtol=1e-2)

    print("KERNEL_OK")
</pallas_src>

<mosaic_0001>
module attributes {stable_mosaic.version = 11 : i64} {
  func.func @_classifier_kernel(%arg0: i32, %arg1: memref<8x32xf32, #tpu.memory_space<vmem>>, %arg2: memref<8x768xf32, #tpu.memory_space<vmem>>, %arg3: memref<32x128xbf16, #tpu.memory_space<vmem>>, %arg4: memref<1x128xf32, #tpu.memory_space<vmem>>, %arg5: memref<128x128xbf16, #tpu.memory_space<vmem>>, %arg6: memref<1x128xf32, #tpu.memory_space<vmem>>, %arg7: memref<768x128xbf16, #tpu.memory_space<vmem>>, %arg8: memref<1x128xf32, #tpu.memory_space<vmem>>, %arg9: memref<128x128xbf16, #tpu.memory_space<vmem>>, %arg10: memref<1x128xf32, #tpu.memory_space<vmem>>, %arg11: memref<128x128xbf16, #tpu.memory_space<vmem>>, %arg12: memref<128x128xbf16, #tpu.memory_space<vmem>>, %arg13: memref<1x128xf32, #tpu.memory_space<vmem>>, %arg14: memref<128x128xbf16, #tpu.memory_space<vmem>>, %arg15: memref<1x128xf32, #tpu.memory_space<vmem>>, %arg16: memref<8x128xf32, #tpu.memory_space<vmem>>, %arg17: memref<8x128xf32, #tpu.memory_space<vmem>>, %arg18: memref<8x128xf32, #tpu.memory_space<vmem>>) attributes {dimension_semantics = [#tpu.dimension_semantics<parallel>], iteration_bounds = array<i64: 1>, scalar_prefetch = 0 : i64, scratch_operands = 0 : i64, tpu.core_type = #tpu.core_type<tc>, window_params = [{transform_indices = @transform_0, window_bounds = array<i64: 8, 32>}, {transform_indices = @transform_1, window_bounds = array<i64: 8, 768>}, {pipeline_mode = #tpu.pipeline_mode<synchronous>, transform_indices = @transform_2, window_bounds = array<i64: 32, 128>}, {pipeline_mode = #tpu.pipeline_mode<synchronous>, transform_indices = @transform_3, window_bounds = array<i64: 1, 128>}, {pipeline_mode = #tpu.pipeline_mode<synchronous>, transform_indices = @transform_4, window_bounds = array<i64: 128, 128>}, {pipeline_mode = #tpu.pipeline_mode<synchronous>, transform_indices = @transform_5, window_bounds = array<i64: 1, 128>}, {pipeline_mode = #tpu.pipeline_mode<synchronous>, transform_indices = @transform_6, window_bounds = array<i64: 768, 128>}, {pipeline_mode = #tpu.pipeline_mode<synchronous>, transform_indices = @transform_7, window_bounds = array<i64: 1, 128>}, {pipeline_mode = #tpu.pipeline_mode<synchronous>, transform_indices = @transform_8, window_bounds = array<i64: 128, 128>}, {pipeline_mode = #tpu.pipeline_mode<synchronous>, transform_indices = @transform_9, window_bounds = array<i64: 1, 128>}, {pipeline_mode = #tpu.pipeline_mode<synchronous>, transform_indices = @transform_10, window_bounds = array<i64: 128, 128>}, {pipeline_mode = #tpu.pipeline_mode<synchronous>, transform_indices = @transform_11, window_bounds = array<i64: 128, 128>}, {pipeline_mode = #tpu.pipeline_mode<synchronous>, transform_indices = @transform_12, window_bounds = array<i64: 1, 128>}, {pipeline_mode = #tpu.pipeline_mode<synchronous>, transform_indices = @transform_13, window_bounds = array<i64: 128, 128>}, {pipeline_mode = #tpu.pipeline_mode<synchronous>, transform_indices = @transform_14, window_bounds = array<i64: 1, 128>}, {transform_indices = @transform_15, window_bounds = array<i64: 8, 128>}, {transform_indices = @transform_16, window_bounds = array<i64: 8, 128>}, {transform_indices = @transform_17, window_bounds = array<i64: 8, 128>}]} {
    %c0 = arith.constant 0 : index
    %c0_0 = arith.constant 0 : index
    %0 = vector.load %arg1[%c0, %c0_0] : memref<8x32xf32, #tpu.memory_space<vmem>>, vector<8x32xf32>
    %1 = arith.truncf %0 : vector<8x32xf32> to vector<8x32xbf16>
    %c0_1 = arith.constant 0 : index
    %c0_2 = arith.constant 0 : index
    %2 = vector.load %arg3[%c0_1, %c0_2] : memref<32x128xbf16, #tpu.memory_space<vmem>>, vector<32x128xbf16>
    %cst = arith.constant dense<0.000000e+00> : vector<8x128xf32>
    %3 = tpu.matmul %1, %2, %cst {dimension_numbers = #tpu.dot_dimension_numbers<[1], [0], [0], [1], [0, 0, 1, 1], [], []>} : vector<8x32xbf16>, vector<32x128xbf16>, vector<8x128xf32> -> vector<8x128xf32>
    %c0_3 = arith.constant 0 : index
    %c0_4 = arith.constant 0 : index
    %4 = vector.load %arg4[%c0_3, %c0_4] : memref<1x128xf32, #tpu.memory_space<vmem>>, vector<1x128xf32>
    %5 = vector.broadcast %4 : vector<1x128xf32> to vector<8x128xf32>
    %6 = arith.addf %3, %5 : vector<8x128xf32>
    %cst_5 = arith.constant 0.000000e+00 : f32
    %7 = vector.broadcast %cst_5 : f32 to vector<8x128xf32>
    %8 = arith.maximumf %6, %7 : vector<8x128xf32>
    %9 = arith.truncf %8 : vector<8x128xf32> to vector<8x128xbf16>
    %c0_6 = arith.constant 0 : index
    %c0_7 = arith.constant 0 : index
    %10 = vector.load %arg5[%c0_6, %c0_7] : memref<128x128xbf16, #tpu.memory_space<vmem>>, vector<128x128xbf16>
    %cst_8 = arith.constant dense<0.000000e+00> : vector<8x128xf32>
    %11 = tpu.matmul %9, %10, %cst_8 {dimension_numbers = #tpu.dot_dimension_numbers<[1], [0], [0], [1], [0, 0, 1, 1], [], []>} : vector<8x128xbf16>, vector<128x128xbf16>, vector<8x128xf32> -> vector<8x128xf32>
    %c0_9 = arith.constant 0 : index
    %c0_10 = arith.constant 0 : index
    %12 = vector.load %arg6[%c0_9, %c0_10] : memref<1x128xf32, #tpu.memory_space<vmem>>, vector<1x128xf32>
    %13 = vector.broadcast %12 : vector<1x128xf32> to vector<8x128xf32>
    %14 = arith.addf %11, %13 : vector<8x128xf32>
    %cst_11 = arith.constant 0.000000e+00 : f32
    %15 = vector.broadcast %cst_11 : f32 to vector<8x128xf32>
    %16 = arith.maximumf %14, %15 : vector<8x128xf32>
    %c0_12 = arith.constant 0 : index
    %c0_13 = arith.constant 0 : index
    %17 = vector.load %arg17[%c0_12, %c0_13] : memref<8x128xf32, #tpu.memory_space<vmem>>, vector<8x128xf32>
    tpu.vector_store %arg17[%c0_12, %c0_13], %16 {strides = array<i32>} : memref<8x128xf32, #tpu.memory_space<vmem>>, vector<8x128xf32>,
    %18 = arith.truncf %16 : vector<8x128xf32> to vector<8x128xbf16>
    %c0_14 = arith.constant 0 : index
    %c0_15 = arith.constant 0 : index
    %19 = vector.load %arg2[%c0_14, %c0_15] : memref<8x768xf32, #tpu.memory_space<vmem>>, vector<8x768xf32>
    %20 = arith.truncf %19 : vector<8x768xf32> to vector<8x768xbf16>
    %c0_16 = arith.constant 0 : index
    %c0_17 = arith.constant 0 : index
    %21 = vector.load %arg7[%c0_16, %c0_17] : memref<768x128xbf16, #tpu.memory_space<vmem>>, vector<768x128xbf16>
    %cst_18 = arith.constant dense<0.000000e+00> : vector<8x128xf32>
    %22 = tpu.matmul %20, %21, %cst_18 {dimension_numbers = #tpu.dot_dimension_numbers<[1], [0], [0], [1], [0, 0, 1, 1], [], []>} : vector<8x768xbf16>, vector<768x128xbf16>, vector<8x128xf32> -> vector<8x128xf32>
    %c0_19 = arith.constant 0 : index
    %c0_20 = arith.constant 0 : index
    %23 = vector.load %arg8[%c0_19, %c0_20] : memref<1x128xf32, #tpu.memory_space<vmem>>, vector<1x128xf32>
    %24 = vector.broadcast %23 : vector<1x128xf32> to vector<8x128xf32>
    %25 = arith.addf %22, %24 : vector<8x128xf32>
    %cst_21 = arith.constant 0.000000e+00 : f32
    %26 = vector.broadcast %cst_21 : f32 to vector<8x128xf32>
    %27 = arith.maximumf %25, %26 : vector<8x128xf32>
    %28 = arith.truncf %27 : vector<8x128xf32> to vector<8x128xbf16>
    %c0_22 = arith.constant 0 : index
    %c0_23 = arith.constant 0 : index
    %29 = vector.load %arg9[%c0_22, %c0_23] : memref<128x128xbf16, #tpu.memory_space<vmem>>, vector<128x128xbf16>
    %cst_24 = arith.constant dense<0.000000e+00> : vector<8x128xf32>
    %30 = tpu.matmul %28, %29, %cst_24 {dimension_numbers = #tpu.dot_dimension_numbers<[1], [0], [0], [1], [0, 0, 1, 1], [], []>} : vector<8x128xbf16>, vector<128x128xbf16>, vector<8x128xf32> -> vector<8x128xf32>
    %c0_25 = arith.constant 0 : index
    %c0_26 = arith.constant 0 : index
    %31 = vector.load %arg10[%c0_25, %c0_26] : memref<1x128xf32, #tpu.memory_space<vmem>>, vector<1x128xf32>
    %32 = vector.broadcast %31 : vector<1x128xf32> to vector<8x128xf32>
    %33 = arith.addf %30, %32 : vector<8x128xf32>
    %cst_27 = arith.constant 0.000000e+00 : f32
    %34 = vector.broadcast %cst_27 : f32 to vector<8x128xf32>
    %35 = arith.maximumf %33, %34 : vector<8x128xf32>
    %c0_28 = arith.constant 0 : index
    %c0_29 = arith.constant 0 : index
    %36 = vector.load %arg18[%c0_28, %c0_29] : memref<8x128xf32, #tpu.memory_space<vmem>>, vector<8x128xf32>
    tpu.vector_store %arg18[%c0_28, %c0_29], %35 {strides = array<i32>} : memref<8x128xf32, #tpu.memory_space<vmem>>, vector<8x128xf32>,
    %37 = arith.truncf %35 : vector<8x128xf32> to vector<8x128xbf16>
    %c0_30 = arith.constant 0 : index
    %c0_31 = arith.constant 0 : index
    %38 = vector.load %arg11[%c0_30, %c0_31] : memref<128x128xbf16, #tpu.memory_space<vmem>>, vector<128x128xbf16>
    %cst_32 = arith.constant dense<0.000000e+00> : vector<8x128xf32>
    %39 = tpu.matmul %18, %38, %cst_32 {dimension_numbers = #tpu.dot_dimension_numbers<[1], [0], [0], [1], [0, 0, 1, 1], [], []>} : vector<8x128xbf16>, vector<128x128xbf16>, vector<8x128xf32> -> vector<8x128xf32>
    %c0_33 = arith.constant 0 : index
    %c0_34 = arith.constant 0 : index
    %40 = vector.load %arg12[%c0_33, %c0_34] : memref<128x128xbf16, #tpu.memory_space<vmem>>, vector<128x128xbf16>
    %cst_35 = arith.constant dense<0.000000e+00> : vector<8x128xf32>
    %41 = tpu.matmul %37, %40, %cst_35 {dimension_numbers = #tpu.dot_dimension_numbers<[1], [0], [0], [1], [0, 0, 1, 1], [], []>} : vector<8x128xbf16>, vector<128x128xbf16>, vector<8x128xf32> -> vector<8x128xf32>
    %42 = arith.addf %39, %41 : vector<8x128xf32>
    %c0_36 = arith.constant 0 : index
    %c0_37 = arith.constant 0 : index
    %43 = vector.load %arg13[%c0_36, %c0_37] : memref<1x128xf32, #tpu.memory_space<vmem>>, vector<1x128xf32>
    %44 = vector.broadcast %43 : vector<1x128xf32> to vector<8x128xf32>
    %45 = arith.addf %42, %44 : vector<8x128xf32>
    %cst_38 = arith.constant 0.000000e+00 : f32
    %46 = vector.broadcast %cst_38 : f32 to vector<8x128xf32>
    %47 = arith.maximumf %45, %46 : vector<8x128xf32>
    %48 = arith.truncf %47 : vector<8x128xf32> to vector<8x128xbf16>
    %c0_39 = arith.constant 0 : index
    %c0_40 = arith.constant 0 : index
    %49 = vector.load %arg14[%c0_39, %c0_40] : memref<128x128xbf16, #tpu.memory_space<vmem>>, vector<128x128xbf16>
    %cst_41 = arith.constant dense<0.000000e+00> : vector<8x128xf32>
    %50 = tpu.matmul %48, %49, %cst_41 {dimension_numbers = #tpu.dot_dimension_numbers<[1], [0], [0], [1], [0, 0, 1, 1], [], []>} : vector<8x128xbf16>, vector<128x128xbf16>, vector<8x128xf32> -> vector<8x128xf32>
    %c0_42 = arith.constant 0 : index
    %c0_43 = arith.constant 0 : index
    %51 = vector.load %arg15[%c0_42, %c0_43] : memref<1x128xf32, #tpu.memory_space<vmem>>, vector<1x128xf32>
    %52 = vector.broadcast %51 : vector<1x128xf32> to vector<8x128xf32>
    %53 = arith.addf %50, %52 : vector<8x128xf32>
    %c0_44 = arith.constant 0 : index
    %c0_45 = arith.constant 0 : index
    %54 = vector.load %arg16[%c0_44, %c0_45] : memref<8x128xf32, #tpu.memory_space<vmem>>, vector<8x128xf32>
    tpu.vector_store %arg16[%c0_44, %c0_45], %53 {strides = array<i32>} : memref<8x128xf32, #tpu.memory_space<vmem>>, vector<8x128xf32>,
    return
  }
  func.func @transform_0(%arg0: i32) -> (i32, i32) {
    %c0_i32 = arith.constant 0 : i32
    %c0_i32_0 = arith.constant 0 : i32
    return %arg0, %c0_i32 : i32, i32
  }
  func.func @transform_1(%arg0: i32) -> (i32, i32) {
    %c0_i32 = arith.constant 0 : i32
    %c0_i32_0 = arith.constant 0 : i32
    return %arg0, %c0_i32 : i32, i32
  }
  func.func @transform_2(%arg0: i32) -> (i32, i32) {
    %c0_i32 = arith.constant 0 : i32
    %c0_i32_0 = arith.constant 0 : i32
    %c0_i32_1 = arith.constant 0 : i32
    return %c0_i32, %c0_i32_0 : i32, i32
  }
  func.func @transform_3(%arg0: i32) -> (i32, i32) {
    %c0_i32 = arith.constant 0 : i32
    %c0_i32_0 = arith.constant 0 : i32
    %c0_i32_1 = arith.constant 0 : i32
    return %c0_i32, %c0_i32_0 : i32, i32
  }
  func.func @transform_4(%arg0: i32) -> (i32, i32) {
    %c0_i32 = arith.constant 0 : i32
    %c0_i32_0 = arith.constant 0 : i32
    %c0_i32_1 = arith.constant 0 : i32
    return %c0_i32, %c0_i32_0 : i32, i32
  }
  func.func @transform_5(%arg0: i32) -> (i32, i32) {
    %c0_i32 = arith.constant 0 : i32
    %c0_i32_0 = arith.constant 0 : i32
    %c0_i32_1 = arith.constant 0 : i32
    return %c0_i32, %c0_i32_0 : i32, i32
  }
  func.func @transform_6(%arg0: i32) -> (i32, i32) {
    %c0_i32 = arith.constant 0 : i32
    %c0_i32_0 = arith.constant 0 : i32
    %c0_i32_1 = arith.constant 0 : i32
    return %c0_i32, %c0_i32_0 : i32, i32
  }
  func.func @transform_7(%arg0: i32) -> (i32, i32) {
    %c0_i32 = arith.constant 0 : i32
    %c0_i32_0 = arith.constant 0 : i32
    %c0_i32_1 = arith.constant 0 : i32
    return %c0_i32, %c0_i32_0 : i32, i32
  }
  func.func @transform_8(%arg0: i32) -> (i32, i32) {
    %c0_i32 = arith.constant 0 : i32
    %c0_i32_0 = arith.constant 0 : i32
    %c0_i32_1 = arith.constant 0 : i32
    return %c0_i32, %c0_i32_0 : i32, i32
  }
  func.func @transform_9(%arg0: i32) -> (i32, i32) {
    %c0_i32 = arith.constant 0 : i32
    %c0_i32_0 = arith.constant 0 : i32
    %c0_i32_1 = arith.constant 0 : i32
    return %c0_i32, %c0_i32_0 : i32, i32
  }
  func.func @transform_10(%arg0: i32) -> (i32, i32) {
    %c0_i32 = arith.constant 0 : i32
    %c0_i32_0 = arith.constant 0 : i32
    %c0_i32_1 = arith.constant 0 : i32
    return %c0_i32, %c0_i32_0 : i32, i32
  }
  func.func @transform_11(%arg0: i32) -> (i32, i32) {
    %c0_i32 = arith.constant 0 : i32
    %c0_i32_0 = arith.constant 0 : i32
    %c0_i32_1 = arith.constant 0 : i32
    return %c0_i32, %c0_i32_0 : i32, i32
  }
  func.func @transform_12(%arg0: i32) -> (i32, i32) {
    %c0_i32 = arith.constant 0 : i32
    %c0_i32_0 = arith.constant 0 : i32
    %c0_i32_1 = arith.constant 0 : i32
    return %c0_i32, %c0_i32_0 : i32, i32
  }
  func.func @transform_13(%arg0: i32) -> (i32, i32) {
    %c0_i32 = arith.constant 0 : i32
    %c0_i32_0 = arith.constant 0 : i32
    %c0_i32_1 = arith.constant 0 : i32
    return %c0_i32, %c0_i32_0 : i32, i32
  }
  func.func @transform_14(%arg0: i32) -> (i32, i32) {
    %c0_i32 = arith.constant 0 : i32
    %c0_i32_0 = arith.constant 0 : i32
    %c0_i32_1 = arith.constant 0 : i32
    return %c0_i32, %c0_i32_0 : i32, i32
  }
  func.func @transform_15(%arg0: i32) -> (i32, i32) {
    %c0_i32 = arith.constant 0 : i32
    %c0_i32_0 = arith.constant 0 : i32
    return %arg0, %c0_i32 : i32, i32
  }
  func.func @transform_16(%arg0: i32) -> (i32, i32) {
    %c0_i32 = arith.constant 0 : i32
    %c0_i32_0 = arith.constant 0 : i32
    return %arg0, %c0_i32 : i32, i32
  }
  func.func @transform_17(%arg0: i32) -> (i32, i32) {
    %c0_i32 = arith.constant 0 : i32
    %c0_i32_0 = arith.constant 0 : i32
    return %arg0, %c0_i32 : i32, i32
  }
}

</mosaic_0001>

<bundles_post_ra>
// kernel: simple_emotion_classifier.1
= control target key start
LH: loop header
LB: loop body
LE: loop exit
PB: predicated region body
PF: predicated region fallthrough
CT: control target
= control target key end

     0   :  { %s2257_s0 = inlined_call_operand.hbm [shape: f32[8,32], index: 0, kind: input, shape index: {}]   ;;  %s2258_s1 = inlined_call_operand.hbm [shape: f32[8,768], index: 1, kind: input, shape index: {}]   ;;  %s2259_s2 = inlined_call_operand.hbm [shape: bf16[32,128], index: 2, kind: input, shape index: {}]   ;;  %s2260_s3 = inlined_call_operand.vmem [shape: f32[1,128], index: 3, kind: input, shape index: {}]   ;;  %s2261_s4 = inlined_call_operand.hbm [shape: bf16[128,128], index: 4, kind: input, shape index: {}]   ;;  %s2262_s5 = inlined_call_operand.vmem [shape: f32[1,128], index: 5, kind: input, shape index: {}]   ;;  %s2263_s6 = inlined_call_operand.hbm [shape: bf16[768,128], index: 6, kind: input, shape index: {}]   ;;  %s2264_s7 = inlined_call_operand.vmem [shape: f32[1,128], index: 7, kind: input, shape index: {}]   ;;  %s2265_s8 = inlined_call_operand.hbm [shape: bf16[128,128], index: 8, kind: input, shape index: {}]   ;;  %s2266_s9 = inlined_call_operand.vmem [shape: f32[1,128], index: 9, kind: input, shape index: {}]   ;;  %s2267_s10 = inlined_call_operand.hbm [shape: bf16[128,128], index: 10, kind: input, shape index: {}]   ;;  %s2268_s11 = inlined_call_operand.hbm [shape: bf16[128,128], index: 11, kind: input, shape index: {}]   ;;  %s2269_s12 = inlined_call_operand.vmem [shape: f32[1,128], index: 12, kind: input, shape index: {}]   ;;  %s2270_s13 = inlined_call_operand.hbm [shape: bf16[128,128], index: 13, kind: input, shape index: {}]   ;;  %s2271_s14 = inlined_call_operand.vmem [shape: f32[1,128], index: 14, kind: input, shape index: {}]   ;;  %s2272_s15 = inlined_call_operand.vmem [shape: f32[8,128], index: 15, kind: output, shape index: {0}]   ;;  %s2273_s16 = inlined_call_operand.hbm [shape: f32[8,128], index: 16, kind: output, shape index: {1}]   ;;  %s2274_s17 = inlined_call_operand.hbm [shape: f32[8,128], index: 17, kind: output, shape index: {2}]  }
   0x1   :  { %2275 = sst [smem:[#allocation27_spill]] %s2257_s0 }
   0x2   :  { %2276 = sst [smem:[#allocation28_spill]] %s2258_s1 }
   0x3   :  { %23 = vsyncpa [#allocation3], 0 }
   0x4   :  { %24 = vsyncpa [#allocation6], 0 }
   0x5   :  { %25 = vsyncpa [#allocation9], 0 }
   0x6   :  { %26 = vsyncpa [#allocation12], 0 }
   0x7   :  { %27 = vsyncpa [#allocation15], 0 }
   0x8   :  { %28 = vsyncpa [#allocation4], 0 }
   0x9   :  { %29 = vsyncpa [#allocation19], 0  ;;  %s2023_s24 = smov [#allocation5]  }
   0xa   :  { %s46_s25 = sshll.u32 %s2023_s24, 4  ;;  %s47_s25 = int_to_ptr.vmem [resolvable:$true] %s46_s25 }
   0xb   :  { %s1797_s26 = scalar_lea.vmem %s47_s25, 768  ;;  %p1802_p1 = scmp.lt.s32.totalorder %s47_s25, %s47_s25 }
   0xc   :  { %p1798_p0 = scmp.ne.s32.totalorder %s47_s25, %s1797_s26  ;;  %p1803_p2 = scmp.lt.s32.totalorder %s1797_s26, %s1797_s26 }
   0xe   :  { %p1804_p3 = por %p1803_p2, %p1802_p1 }
  0x10   :  { %p1805_p4 = pnand %p1804_p3, %p1798_p0 }
  0x12   :  { %1808 = shalt.err (!%p1805_p4)
}
  0x13   :  { %s2277_s29 = sld [smem:[#allocation28_spill]]  ;;  %s2024_s0 = smov [#allocation8]  }
  0x14   :  { %s69_s30 = sshll.u32 %s2024_s0, 4  ;;  %s2025_s18 = smov [#allocation11]   ;;  %s70_s30 = int_to_ptr.vmem [resolvable:$true] %s69_s30 }
  0x15   :  { %s97_s19 = sshll.u32 %s2025_s18, 4  ;;  %s1817_s1 = scalar_lea.vmem %s70_s30, 1024  ;;  %s98_s19 = int_to_ptr.vmem [resolvable:$true] %s97_s19 }
  0x16   :  { %p1818_p5 = scmp.ne.s32.totalorder %s70_s30, %s1817_s1  ;;  %p1822_p6 = scmp.lt.s32.totalorder %s70_s30, %s70_s30 }
  0x17   :  { %p1823_p7 = scmp.lt.s32.totalorder %s1817_s1, %s1817_s1 }
  0x19   :  { %49 = dma.hbm_to_vmem [thread:$0]  %s2277_s29, 768, %s47_s25, [#allocation6]  }
  0x1a   :  { %p1824_p8 = por %p1823_p7, %p1822_p6 }
  0x1c   :  { %p1825_p9 = pnand %p1824_p8, %p1818_p5 }
  0x1e   :  { %1828 = shalt.err (!%p1825_p9)
}
  0x1f   :  { %s2026_s20 = smov 64   ;;  %s2027_s21 = smov 4  }
  0x20   :  { %75 = dma.hbm_to_vmem [thread:$0]  %s2261_s4, 1024, %s70_s30, [#allocation9], %s2026_s20, %s2026_s20, %s2027_s21  }
  0x21   :  { %s1837_s24 = scalar_lea.vmem %s98_s19, 1024  ;;  %p1842_p11 = scmp.lt.s32.totalorder %s98_s19, %s98_s19 }
  0x22   :  { %p1838_p10 = scmp.ne.s32.totalorder %s98_s19, %s1837_s24  ;;  %p1843_p12 = scmp.lt.s32.totalorder %s1837_s24, %s1837_s24 }
  0x24   :  { %p1844_p13 = por %p1843_p12, %p1842_p11 }
  0x26   :  { %p1845_p0 = pnand %p1844_p13, %p1838_p10 }
  0x28   :  { %1848 = shalt.err (!%p1845_p0)
}
  0x29   :  { %103 = dma.hbm_to_vmem [thread:$0]  %s2265_s8, 1024, %s98_s19, [#allocation12], %s2026_s20, %s2026_s20, %s2027_s21  }
  0x2a   :  { %s2028_s27 = smov [#allocation14]   ;;  %s2029_s29 = smov [#allocation2]  }
  0x2b   :  { %s123_s28 = sshll.u32 %s2028_s27, 4  ;;  %s36_s4 = sshll.u32 %s2029_s29, 4  ;;  %s124_s28 = int_to_ptr.vmem [resolvable:$true] %s123_s28  ;;  %s37_s4 = int_to_ptr.vmem [resolvable:$true] %s36_s4 }
  0x2c   :  { %s1857_s0 = scalar_lea.vmem %s124_s28, 1024  ;;  %p1862_p2 = scmp.lt.s32.totalorder %s124_s28, %s124_s28 }
  0x2d   :  { %p1858_p1 = scmp.ne.s32.totalorder %s124_s28, %s1857_s0  ;;  %p1863_p3 = scmp.lt.s32.totalorder %s1857_s0, %s1857_s0 }
  0x2f   :  { %p1864_p4 = por %p1863_p3, %p1862_p2 }
  0x31   :  { %p1865_p5 = pnand %p1864_p4, %p1858_p1 }
  0x33   :  { %1868 = shalt.err (!%p1865_p5)
}
  0x34   :  { %129 = dma.hbm_to_vmem [thread:$0]  %s2268_s11, 1024, %s124_s28, [#allocation15], %s2026_s20, %s2026_s20, %s2027_s21  }
  0x35   :  { %s1877_s8 = scalar_lea.vmem %s37_s4, 128  ;;  %p1882_p7 = scmp.lt.s32.totalorder %s37_s4, %s37_s4 }
  0x36   :  { %p1878_p6 = scmp.ne.s32.totalorder %s37_s4, %s1877_s8  ;;  %p1883_p8 = scmp.lt.s32.totalorder %s1877_s8, %s1877_s8 }
  0x38   :  { %p1884_p9 = por %p1883_p8, %p1882_p7 }
  0x3a   :  { %p1885_p10 = pnand %p1884_p9, %p1878_p6 }
  0x3c   :  { %1888 = shalt.err (!%p1885_p10)
}
  0x3d   :  { %s2278_s22 = sld [smem:[#allocation27_spill]]  ;;  %s2030_s23 = smov [#allocation7]  }
  0x3e   :  { %s55_s24 = sshll.u32 %s2030_s23, 4  ;;  %s2031_s25 = smov [#allocation10]   ;;  %s56_s24 = int_to_ptr.vmem [resolvable:$true] %s55_s24 }
  0x3f   :  { %s83_s26 = sshll.u32 %s2031_s25, 4  ;;  %s1897_s27 = scalar_lea.vmem %s56_s24, 256  ;;  %s84_s26 = int_to_ptr.vmem [resolvable:$true] %s83_s26 }
  0x40   :  { %p1898_p11 = scmp.ne.s32.totalorder %s56_s24, %s1897_s27  ;;  %p1902_p12 = scmp.lt.s32.totalorder %s56_s24, %s56_s24 }
  0x41   :  { %p1903_p13 = scmp.lt.s32.totalorder %s1897_s27, %s1897_s27 }
  0x43   :  { %39 = dma.hbm_to_vmem [thread:$0]  %s2278_s22, 128, %s37_s4, [#allocation3]  }
  0x44   :  { %p1904_p0 = por %p1903_p13, %p1902_p12 }
  0x46   :  { %p1905_p1 = pnand %p1904_p0, %p1898_p11 }
  0x48   :  { %1908 = shalt.err (!%p1905_p1)
}
  0x49   :  { %61 = dma.hbm_to_vmem [thread:$0]  %s2259_s2, 256, %s56_s24, [#allocation6], %s2026_s20, %s2026_s20, %s2027_s21  }
  0x4a   :  { %s1917_s29 = scalar_lea.vmem %s84_s26, 6144  ;;  %p1922_p3 = scmp.lt.s32.totalorder %s84_s26, %s84_s26 }
  0x4b   :  { %p1918_p2 = scmp.ne.s32.totalorder %s84_s26, %s1917_s29  ;;  %p1923_p4 = scmp.lt.s32.totalorder %s1917_s29, %s1917_s29 }
  0x4d   :  { %p1924_p5 = por %p1923_p4, %p1922_p3 }
  0x4f   :  { %p1925_p6 = pnand %p1924_p5, %p1918_p2 }
  0x51   :  { %1928 = shalt.err (!%p1925_p6)
}
  0x52   :  { %89 = dma.hbm_to_vmem [thread:$0]  %s2263_s6, 6144, %s84_s26, [#allocation9], %s2026_s20, %s2026_s20, %s2027_s21  }
  0x53   :  { %s2032_s30 = smov [#allocation13]   ;;  %s2033_s8 = smov [#allocation16]  }
  0x54   :  { %s111_s18 = sshll.u32 %s2032_s30, 4  ;;  %s137_s2 = sshll.u32 %s2033_s8, 4  ;;  %s112_s18 = int_to_ptr.vmem [resolvable:$true] %s111_s18  ;;  %s138_s2 = int_to_ptr.vmem [resolvable:$true] %s137_s2 }
  0x55   :  { %s1937_s19 = scalar_lea.vmem %s112_s18, 1024  ;;  %p1942_p8 = scmp.lt.s32.totalorder %s112_s18, %s112_s18 }
  0x56   :  { %p1938_p7 = scmp.ne.s32.totalorder %s112_s18, %s1937_s19  ;;  %p1943_p9 = scmp.lt.s32.totalorder %s1937_s19, %s1937_s19 }
  0x58   :  { %p1944_p10 = por %p1943_p9, %p1942_p8 }
  0x5a   :  { %p1945_p11 = pnand %p1944_p10, %p1938_p7 }
  0x5c   :  { %1948 = shalt.err (!%p1945_p11)
}
  0x5d   :  { %117 = dma.hbm_to_vmem [thread:$0]  %s2267_s10, 1024, %s112_s18, [#allocation12], %s2026_s20, %s2026_s20, %s2027_s21  }
  0x5e   :  { %s1957_s6 = scalar_lea.vmem %s138_s2, 1024  ;;  %p1962_p13 = scmp.lt.s32.totalorder %s138_s2, %s138_s2 }
  0x5f   :  { %p1958_p12 = scmp.ne.s32.totalorder %s138_s2, %s1957_s6  ;;  %p1963_p0 = scmp.lt.s32.totalorder %s1957_s6, %s1957_s6 }
  0x61   :  { %p1964_p1 = por %p1963_p0, %p1962_p13 }
  0x63   :  { %p1965_p2 = pnand %p1964_p1, %p1958_p12 }
  0x65   :  { %1968 = shalt.err (!%p1965_p2)
}
  0x66   :  { %143 = dma.hbm_to_vmem [thread:$0]  %s2270_s13, 1024, %s138_s2, [#allocation15], %s2026_s20, %s2026_s20, %s2027_s21  }
  0x67   :  { %2009 = dma.done.wait [#allocation3], 128  }
  0x68   :  { %2010 = vsyncadd [#allocation3], 4294967168 }
  0x69   :  { %2011 = dma.done.wait [#allocation6], 1024  }
  0x6a   :  { %2012 = vsyncadd [#allocation6], 4294966272 }
  0x6b   :  { %2013 = dma.done.wait [#allocation9], 7168  }
  0x6c   :  { %2014 = vsyncadd [#allocation9], 4294960128 }
  0x6d   :  { %2015 = dma.done.wait [#allocation12], 2048  }
  0x6e   :  { %2016 = vsyncadd [#allocation12], 4294965248 }
  0x6f   :  { %2017 = dma.done.wait [#allocation15], 2048  }
  0x70   :  { %2018 = vsyncadd [#allocation15], 4294965248  ;;  %v2034_v0 = vmov 0.0   ;;  %vm2035_vm0 = vmmov 0   ;;  %v1699_v1 = vld [vmem:[#allocation7 + $0x8] sm:$0xff]   ;;  %v1700_v2 = vld [vmem:[#allocation7] sm:$0xff]  }
  0x71   :  { %1576 = vmatprep.subr.bf16.mxu0 %v2034_v0  ;;  %1580 = vmatprep.mubr.msk.bf16.mxu0 %vm2035_vm0, %v2034_v0  ;;  %v174_v3 = vld [vmem:[#allocation2] sm:$0xff]  ;;  %vm199_vm1 = vcmask 261120   ;;  %v1703_v8 = vld [vmem:[#allocation10 + $0x70] sm:$0xff]   ;;  %v1706_v11 = vld [vmem:[#allocation10 + $0x68] sm:$0xff]   ;;  %s2036_s27 = smov [#allocation17]   ;;  %s2037_s28 = smov [#allocation18]  }
  0x72   :  { %1584 = vmatprep.subr.bf16.mxu1 %v2034_v0  ;;  %1600 = vmatprep.mubr.msk.bf16.mxu1 %vm2035_vm0, %v2034_v0  ;;  %v1701_v4 = vld [vmem:[#allocation10 + $0x78] sm:$0xff]   ;;  %v175_v5 = vpack.c.bf16 %v174_v3, %v174_v3  ;;  %v1707_v9 = vld [vmem:[#allocation8 + $0x30] sm:$0xff]   ;;  %v1710_v12 = vld [vmem:[#allocation8 + $0x28] sm:$0xff]   ;;  %s1336_s11 = sshll.u32 %s2036_s27, 4  ;;  %s1346_s29 = sshll.u32 %s2037_s28, 4  ;;  %s1337_s11 = int_to_ptr.vmem [resolvable:$true] %s1336_s11  ;;  %s1347_s29 = int_to_ptr.vmem [resolvable:$true] %s1346_s29 }
  0x73   :  { %1577 = vmatpush3.bf16.msra.mxu0 %v1699_v1  ;;  %v1702_v6 = vld [vmem:[#allocation10 + $0x38] sm:$0xff]   ;;  %v1705_v10 = vld [vmem:[#allocation10 + $0x30] sm:$0xff]   ;;  %v1708_v13 = vld [vmem:[#allocation10 + $0x28] sm:$0xff]   ;;  %s1969_s4 = scalar_lea.vmem %s1337_s11, 128  ;;  %p1974_p4 = scmp.lt.s32.totalorder %s1337_s11, %s1337_s11 }
  0x74   :  { %1578 = vmatprep.subr.bf16.mxu0 %v2034_v0  ;;  %v1704_v7 = vld [vmem:[#allocation8 + $0x38] sm:$0xff]   ;;  %v1709_v14 = vld [vmem:[#allocation10 + $0x60] sm:$0xff]   ;;  %v1715_v20 = vld [vmem:[#allocation10 + $0x50] sm:$0xff]   ;;  %p1970_p3 = scmp.ne.s32.totalorder %s1337_s11, %s1969_s4  ;;  %p1975_p5 = scmp.lt.s32.totalorder %s1969_s4, %s1969_s4 }
  0x75   :  { %1585 = vmatpush3.bf16.msra.mxu1 %v1704_v7  ;;  %v1713_v15 = vld [vmem:[#allocation8 + $0x20] sm:$0xff]   ;;  %v1712_v17 = vld [vmem:[#allocation10 + $0x58] sm:$0xff]   ;;  %v1719_v21 = vld [vmem:[#allocation8 + $0x10] sm:$0xff]  }
  0x76   :  { %1586 = vmatprep.subr.bf16.mxu1 %v2034_v0  ;;  %v1711_v16 = vld [vmem:[#allocation10 + $0x20] sm:$0xff]   ;;  %v1716_v18 = vld [vmem:[#allocation8 + $0x18] sm:$0xff]   ;;  %v1717_v22 = vld [vmem:[#allocation10 + $0x10] sm:$0xff]   ;;  %p1976_p6 = por %p1975_p5, %p1974_p4 }
  0x77   :  { %1579 = vmatpush3.bf16.msra.mxu0 %v1700_v2  ;;  %v1714_v19 = vld [vmem:[#allocation10 + $0x18] sm:$0xff]   ;;  %v1718_v23 = vld [vmem:[#allocation10 + $0x48] sm:$0xff]   ;;  %v1721_v26 = vld [vmem:[#allocation10 + $0x40] sm:$0xff]  }
  0x78   :  { %1474 = vmatprep.subr.bf16.mxu0 %v1701_v4  ;;  %v1722_v24 = vld [vmem:[#allocation8 + $0x8] sm:$0xff]   ;;  %v1723_v27 = vld [vmem:[#allocation10] sm:$0xff]   ;;  %v1724_v30 = vld [vmem:[#allocation10 + $0x178] sm:$0xff]   ;;  %p1977_p7 = pnand %p1976_p6, %p1970_p3 }
  0x79   :  { %1587 = vmatpush3.bf16.msra.mxu1 %v1707_v9  ;;  %v1720_v25 = vld [vmem:[#allocation10 + $0x8] sm:$0xff]   ;;  %v359_v31 = vld [vmem:[#allocation5] sm:$0xff]  ;;  %v1726_v34 = vld [vmem:[#allocation10 + $0x138] sm:$0xff]  }
  0x7a   :  { %1581 = vmatmul.mubr.msk.bf16.vlgmr.msra.gmra.mxu0 %vm199_vm1, %v175_v5  ;;  %1588 = vmatprep.subr.bf16.mxu1 %v2034_v0  ;;  %v360_v28 = vld [vmem:[#allocation5 + $0x8] sm:$0xff]  ;;  %v1725_v32 = vld [vmem:[#allocation8] sm:$0xff]   ;;  %v365_v33 = vpack.c.bf16 %v359_v31, %v359_v31  ;;  %v1727_v35 = vld [vmem:[#allocation10 + $0xf8] sm:$0xff]  }
  0x7b   :  { %1475 = vmatpush3.bf16.msra.mxu0 %v1702_v6  ;;  %v366_v29 = vpack.c.bf16 %v360_v28, %v360_v28  ;;  %v1728_v36 = vld [vmem:[#allocation10 + $0x170] sm:$0xff]   ;;  %v1732_v38 = vld [vmem:[#allocation10 + $0x168] sm:$0xff]   ;;  %v1736_v40 = vld [vmem:[#allocation10 + $0x160] sm:$0xff]  }
  0x7c   :  { %1476 = vmatprep.subr.bf16.mxu0 %v1703_v8  ;;  %v1730_v37 = vld [vmem:[#allocation10 + $0x130] sm:$0xff]   ;;  %v1734_v39 = vld [vmem:[#allocation10 + $0x128] sm:$0xff]   ;;  %v1738_v41 = vld [vmem:[#allocation10 + $0x120] sm:$0xff]  }
  0x7d   :  { %1589 = vmatpush3.bf16.msra.mxu1 %v1710_v12  ;;  %794 = vmatprep.mubr.bf16.mxu0 %v366_v29  ;;  %v1740_v42 = vld [vmem:[#allocation10 + $0x158] sm:$0xff]   ;;  %v1744_v44 = vld [vmem:[#allocation10 + $0x150] sm:$0xff]   ;;  %v1748_v46 = vld [vmem:[#allocation10 + $0x148] sm:$0xff]  }
  0x7e   :  { %1590 = vmatprep.subr.bf16.mxu1 %v2034_v0  ;;  %v1742_v43 = vld [vmem:[#allocation10 + $0x118] sm:$0xff]   ;;  %v1746_v45 = vld [vmem:[#allocation10 + $0x110] sm:$0xff]   ;;  %v1750_v47 = vld [vmem:[#allocation10 + $0x108] sm:$0xff]  }
  0x7f   :  { %1477 = vmatpush3.bf16.msra.mxu0 %v1705_v10  ;;  %v1752_v48 = vld [vmem:[#allocation10 + $0x140] sm:$0xff]   ;;  %v364_v50 = vld [vmem:[#allocation5 + $0x28] sm:$0xff]  ;;  %v1365_v54 = vld [vmem:[%s2260_s3] ss:$0 sm:$0xff] }
  0x80   :  { %1478 = vmatprep.subr.bf16.mxu0 %v1706_v11  ;;  %v1754_v49 = vld [vmem:[#allocation10 + $0x100] sm:$0xff]   ;;  %v370_v51 = vpack.c.bf16 %v364_v50, %v364_v50  ;;  %v362_v57 = vld [vmem:[#allocation5 + $0x18] sm:$0xff]  ;;  %v1731_v1 = vld [vmem:[#allocation10 + $0xf0] sm:$0xff]  }
  0x81   :  { %1591 = vmatpush3.bf16.msra.mxu1 %v1713_v15  ;;  %v363_v52 = vld [vmem:[#allocation5 + $0x20] sm:$0xff]  ;;  %v1729_v61 = vld [vmem:[#allocation10 + $0xb8] sm:$0xff]   ;;  %v368_v62 = vpack.c.bf16 %v362_v57, %v362_v57  ;;  %v1733_v3 = vld [vmem:[#allocation10 + $0xb0] sm:$0xff]  }
  0x82   :  { %1592 = vmatprep.subr.bf16.mxu1 %v2034_v0  ;;  %v369_v53 = vpack.c.bf16 %v363_v52, %v363_v52  ;;  %v1735_v4 = vld [vmem:[#allocation10 + $0xe8] sm:$0xff]   ;;  %v1739_v6 = vld [vmem:[#allocation10 + $0xe0] sm:$0xff]   ;;  %v1743_v8 = vld [vmem:[#allocation10 + $0xd8] sm:$0xff]  }
  0x83   :  { %1479 = vmatpush3.bf16.msra.mxu0 %v1708_v13  ;;  %v1737_v5 = vld [vmem:[#allocation10 + $0xa8] sm:$0xff]   ;;  %v1741_v7 = vld [vmem:[#allocation10 + $0xa0] sm:$0xff]   ;;  %v1745_v9 = vld [vmem:[#allocation10 + $0x98] sm:$0xff]  }
  0x84   :  { %1480 = vmatprep.subr.bf16.mxu0 %v1709_v14  ;;  %v1747_v10 = vld [vmem:[#allocation10 + $0xd0] sm:$0xff]   ;;  %v1751_v12 = vld [vmem:[#allocation10 + $0xc8] sm:$0xff]   ;;  %v1755_v14 = vld [vmem:[#allocation10 + $0xc0] sm:$0xff]  }
  0x85   :  { %1593 = vmatpush3.bf16.msra.mxu1 %v1716_v18  ;;  %v1749_v11 = vld [vmem:[#allocation10 + $0x90] sm:$0xff]   ;;  %v1753_v13 = vld [vmem:[#allocation10 + $0x88] sm:$0xff]   ;;  %v1756_v15 = vld [vmem:[#allocation10 + $0x80] sm:$0xff]  }
  0x86   :  { %1594 = vmatprep.subr.bf16.mxu1 %v2034_v0  ;;  %v1762_v31 = vld [vmem:[#allocation11 + $0x10] sm:$0xff]  }
  0x87   :  { %1481 = vmatpush3.bf16.msra.mxu0 %v1711_v16  ;;  %v361_v16 = vld [vmem:[#allocation5 + $0x10] sm:$0xff] }
  0x88   :  { %1482 = vmatprep.subr.bf16.mxu0 %v1712_v17  ;;  %v367_v17 = vpack.c.bf16 %v361_v16, %v361_v16 }
  0x89   :  { %1595 = vmatpush3.bf16.msra.mxu1 %v1719_v21 }
  0x8a   :  { %1596 = vmatprep.subr.bf16.mxu1 %v2034_v0 }
  0x8b   :  { %1483 = vmatpush3.bf16.msra.mxu0 %v1714_v19 }
  0x8c   :  { %1484 = vmatprep.subr.bf16.mxu0 %v1715_v20 }
  0x8d   :  { %1597 = vmatpush3.bf16.msra.mxu1 %v1722_v24  ;;  %v1758_v24 = vld [vmem:[#allocation11 + $0x30] sm:$0xff]  }
  0x8e   :  { %1598 = vmatprep.subr.bf16.mxu1 %v2034_v0 }
  0x8f   :  { %1485 = vmatpush3.bf16.msra.mxu0 %v1717_v22 }
  0x90   :  { %1486 = vmatprep.subr.bf16.mxu0 %v1718_v23  ;;  %v1757_v23 = vld [vmem:[#allocation11 + $0x38] sm:$0xff]  }
  0x91   :  { %1599 = vmatpush3.bf16.msra.mxu1 %v1725_v32 }
  0x92   :  { %1496 = vmatprep.subr.bf16.mxu1 %v1727_v35  ;;  %v1764_v35 = vld [vmem:[#allocation11] sm:$0xff]  }
  0x93   :  { %1487 = vmatpush3.bf16.msra.mxu0 %v1720_v25  ;;  %v1759_v25 = vld [vmem:[#allocation11 + $0x28] sm:$0xff]  }
  0x94   :  { %1488 = vmatprep.subr.bf16.mxu0 %v1721_v26  ;;  %v1760_v26 = vld [vmem:[#allocation11 + $0x20] sm:$0xff]  }
  0x97   :  { %1489 = vmatpush3.bf16.msra.mxu0 %v1723_v27  ;;  %v1761_v27 = vld [vmem:[#allocation11 + $0x18] sm:$0xff]  }
  0x98   :  { %1518 = vmatprep.subr.bf16.mxu0 %v1724_v30 }
  0x9a   :  { %795 = vmatmul.mubr.bf16.vlgmr.msra.gmra.mxu0 %v365_v33 }
  0x9b   :  { %1519 = vmatpush3.bf16.msra.mxu0 %v1726_v34  ;;  %874 = vmatprep.mubr.bf16.mxu0 %v370_v51  ;;  %v1763_v34 = vld [vmem:[#allocation11 + $0x8] sm:$0xff]  }
  0x9c   :  { %1520 = vmatprep.subr.bf16.mxu0 %v1728_v36  ;;  %v1773_v36 = vld [vmem:[#allocation14 + $0x38] sm:$0xff]  }
  0x9f   :  { %1521 = vmatpush3.bf16.msra.mxu0 %v1730_v37  ;;  %v1774_v37 = vld [vmem:[#allocation14 + $0x30] sm:$0xff]  }
  0xa0   :  { %1522 = vmatprep.subr.bf16.mxu0 %v1732_v38  ;;  %v1775_v38 = vld [vmem:[#allocation14 + $0x28] sm:$0xff]  }
  0xa3   :  { %1523 = vmatpush3.bf16.msra.mxu0 %v1734_v39  ;;  %v1776_v39 = vld [vmem:[#allocation14 + $0x20] sm:$0xff]  }
  0xa4   :  { %1524 = vmatprep.subr.bf16.mxu0 %v1736_v40  ;;  %v1777_v40 = vld [vmem:[#allocation14 + $0x18] sm:$0xff]  }
  0xa7   :  { %1525 = vmatpush3.bf16.msra.mxu0 %v1738_v41  ;;  %v1778_v41 = vld [vmem:[#allocation14 + $0x10] sm:$0xff]  }
  0xa8   :  { %1526 = vmatprep.subr.bf16.mxu0 %v1740_v42  ;;  %v1369_v42 = vld [vmem:[%s2262_s5] ss:$0 sm:$0xff] }
  0xab   :  { %1527 = vmatpush3.bf16.msra.mxu0 %v1742_v43 }
  0xac   :  { %1528 = vmatprep.subr.bf16.mxu0 %v1744_v44 }
  0xaf   :  { %1529 = vmatpush3.bf16.msra.mxu0 %v1746_v45 }
  0xb0   :  { %1530 = vmatprep.subr.bf16.mxu0 %v1748_v46 }
  0xb3   :  { %1531 = vmatpush3.bf16.msra.mxu0 %v1750_v47 }
  0xb4   :  { %1532 = vmatprep.subr.bf16.mxu0 %v1752_v48 }
  0xb7   :  { %1533 = vmatpush3.bf16.msra.mxu0 %v1754_v49  ;;  %v1378_v49 = vld [vmem:[%s2264_s7] ss:$0 sm:$0xff] }
  0xb8   :  { %1624 = vmatprep.subr.bf16.mxu0 %v2034_v0 }
  0xba   :  { %875 = vmatmul.mubr.bf16.vlgmr.msra.gmra.mxu0 %v369_v53 }
  0xbb   :  { %1640 = vmatprep.mubr.msk.bf16.mxu0 %vm2035_vm0, %v2034_v0  ;;  %1625 = vmatpush3.bf16.msra.mxu0 %v1773_v36 }
  0xbc   :  { %1626 = vmatprep.subr.bf16.mxu0 %v2034_v0 }
  0xbf   :  { %1627 = vmatpush3.bf16.msra.mxu0 %v1774_v37 }
  0xc0   :  { %1628 = vmatprep.subr.bf16.mxu0 %v2034_v0 }
  0xc3   :  { %1629 = vmatpush3.bf16.msra.mxu0 %v1775_v38 }
  0xc4   :  { %1630 = vmatprep.subr.bf16.mxu0 %v2034_v0 }
  0xc7   :  { %1631 = vmatpush3.bf16.msra.mxu0 %v1776_v39 }
  0xc8   :  { %1632 = vmatprep.subr.bf16.mxu0 %v2034_v0 }
  0xcb   :  { %1633 = vmatpush3.bf16.msra.mxu0 %v1777_v40 }
  0xcc   :  { %1634 = vmatprep.subr.bf16.mxu0 %v2034_v0 }
  0xcf   :  { %1635 = vmatpush3.bf16.msra.mxu0 %v1778_v41 }
  0xd0   :  { %1636 = vmatprep.subr.bf16.mxu0 %v2034_v0 }
 0x13a   :  { %v237_v55 = vpop.f32.mrf.mxu0 }
 0x13b   :  { %v238_v56 = vadd.f32 %v1365_v54, %v237_v55 }
 0x13c   :  { %v1582_v58 = vpop.f32.mrf.mxu0 }
 0x13d   :  { %v243_v59 = vmax.f32 %v238_v56, 0.0 }
 0x13e   :  { %v240_v60 = vpop.f32.mrf.mxu0 }
 0x13f   :  { %v244_v63 = vpack.c.bf16 %v243_v59, %v243_v59  ;;  %v1765_v59 = vld [vmem:[#allocation13 + $0x38] sm:$0xff]  }
 0x140   :  { %v1583_v2 = vpop.f32.mrf.mxu0 }
 0x141   :  { %1601 = vmatmul.mubr.bf16.vlgmr.msra.gmra.mxu1 %v244_v63  ;;  %v1768_v63 = vld [vmem:[#allocation13 + $0x20] sm:$0xff]   ;;  %v1770_v2 = vld [vmem:[#allocation13 + $0x10] sm:$0xff]  }
 0x142   :  { %1497 = vmatpush3.bf16.msra.mxu1 %v1729_v61  ;;  %834 = vmatprep.mubr.bf16.mxu1 %v368_v62  ;;  %v1766_v61 = vld [vmem:[#allocation13 + $0x30] sm:$0xff]   ;;  %v1767_v62 = vld [vmem:[#allocation13 + $0x28] sm:$0xff]  }
 0x143   :  { %1498 = vmatprep.subr.bf16.mxu1 %v1731_v1  ;;  %v1769_v1 = vld [vmem:[#allocation13 + $0x18] sm:$0xff]  }
 0x146   :  { %1499 = vmatpush3.bf16.msra.mxu1 %v1733_v3  ;;  %v1771_v3 = vld [vmem:[#allocation13 + $0x8] sm:$0xff]  }
 0x147   :  { %1500 = vmatprep.subr.bf16.mxu1 %v1735_v4  ;;  %v1772_v4 = vld [vmem:[#allocation13] sm:$0xff]  }
 0x14a   :  { %1501 = vmatpush3.bf16.msra.mxu1 %v1737_v5 }
 0x14b   :  { %1502 = vmatprep.subr.bf16.mxu1 %v1739_v6  ;;  %v1779_v6 = vld [vmem:[#allocation14 + $0x8] sm:$0xff]  }
 0x14c   :  { %1637 = vmatpush3.bf16.msra.mxu0 %v1779_v6 }
 0x14d   :  { %1638 = vmatprep.subr.bf16.mxu0 %v2034_v0 }
 0x14e   :  { %1503 = vmatpush3.bf16.msra.mxu1 %v1741_v7  ;;  %v1780_v7 = vld [vmem:[#allocation14] sm:$0xff]  }
 0x14f   :  { %1504 = vmatprep.subr.bf16.mxu1 %v1743_v8  ;;  %v1427_v8 = vld [vmem:[%s2266_s9] ss:$0 sm:$0xff] }
 0x150   :  { %1639 = vmatpush3.bf16.msra.mxu0 %v1780_v7 }
 0x151   :  { %1664 = vmatprep.subr.bf16.mxu0 %v2034_v0 }
 0x152   :  { %1505 = vmatpush3.bf16.msra.mxu1 %v1745_v9 }
 0x153   :  { %1506 = vmatprep.subr.bf16.mxu1 %v1747_v10 }
 0x156   :  { %1507 = vmatpush3.bf16.msra.mxu1 %v1749_v11 }
 0x157   :  { %1508 = vmatprep.subr.bf16.mxu1 %v1751_v12 }
 0x15a   :  { %1509 = vmatpush3.bf16.msra.mxu1 %v1753_v13  ;;  %v1490_v18 = vpop.f32.mrf.mxu0 }
 0x15b   :  { %1510 = vmatprep.subr.bf16.mxu1 %v1755_v14  ;;  %v1781_v14 = vld [vmem:[#allocation16 + $0x38] sm:$0xff]  }
 0x15c   :  { %v1491_v19 = vpop.f32.mrf.mxu0 }
 0x15d   :  { %v1492_v20 = vadd.f32 %v1491_v19, %v1490_v18  ;;  %v1783_v18 = vld [vmem:[#allocation16 + $0x28] sm:$0xff]   ;;  %v1784_v19 = vld [vmem:[#allocation16 + $0x20] sm:$0xff]  }
 0x15e   :  { %1511 = vmatpush3.bf16.msra.mxu1 %v1756_v15  ;;  %v1493_v21 = vpop.f32.mrf.mxu0 }
 0x15f   :  { %1604 = vmatprep.subr.bf16.mxu1 %v2034_v0  ;;  %v797_v52 = vadd.f32 %v1492_v20, %v1378_v49  ;;  %v1785_v20 = vld [vmem:[#allocation16 + $0x18] sm:$0xff]   ;;  %v1786_v21 = vld [vmem:[#allocation16 + $0x10] sm:$0xff]  }
 0x160   :  { %v1494_v22 = vpop.f32.mrf.mxu0 }
 0x161   :  { %835 = vmatmul.mubr.bf16.vlgmr.msra.gmra.mxu1 %v367_v17  ;;  %v1782_v17 = vld [vmem:[#allocation16 + $0x30] sm:$0xff]  }
 0x162   :  { %1620 = vmatprep.mubr.msk.bf16.mxu1 %vm2035_vm0, %v2034_v0  ;;  %1605 = vmatpush3.bf16.msra.mxu1 %v1757_v23 }
 0x163   :  { %1606 = vmatprep.subr.bf16.mxu1 %v2034_v0 }
 0x166   :  { %1607 = vmatpush3.bf16.msra.mxu1 %v1758_v24 }
 0x167   :  { %1608 = vmatprep.subr.bf16.mxu1 %v2034_v0 }
 0x16a   :  { %1609 = vmatpush3.bf16.msra.mxu1 %v1759_v25 }
 0x16b   :  { %1610 = vmatprep.subr.bf16.mxu1 %v2034_v0 }
 0x16e   :  { %1611 = vmatpush3.bf16.msra.mxu1 %v1760_v26  ;;  %v1787_v26 = vld [vmem:[#allocation16 + $0x8] sm:$0xff]  }
 0x16f   :  { %1612 = vmatprep.subr.bf16.mxu1 %v2034_v0 }
 0x172   :  { %1613 = vmatpush3.bf16.msra.mxu1 %v1761_v27  ;;  %v1788_v27 = vld [vmem:[#allocation16] sm:$0xff]  }
 0x173   :  { %1614 = vmatprep.subr.bf16.mxu1 %v2034_v0 }
 0x176   :  { %1615 = vmatpush3.bf16.msra.mxu1 %v1762_v31 }
 0x177   :  { %1616 = vmatprep.subr.bf16.mxu1 %v2034_v0 }
 0x17a   :  { %v1534_v28 = vpop.f32.mrf.mxu0  ;;  %1617 = vmatpush3.bf16.msra.mxu1 %v1763_v34 }
 0x17b   :  { %1618 = vmatprep.subr.bf16.mxu1 %v2034_v0 }
 0x17c   :  { %v1535_v29 = vpop.f32.mrf.mxu0 }
 0x17d   :  { %v1536_v30 = vadd.f32 %v1535_v29, %v1534_v28  ;;  %v1452_v29 = vld [vmem:[%s2269_s12] ss:$0 sm:$0xff] }
 0x17e   :  { %v1537_v32 = vpop.f32.mrf.mxu0  ;;  %1619 = vmatpush3.bf16.msra.mxu1 %v1764_v35 }
 0x17f   :  { %1644 = vmatprep.subr.bf16.mxu1 %v2034_v0 }
 0x180   :  { %v1538_v33 = vpop.f32.mrf.mxu0 }
 0x201   :  { %v350_v43 = vpop.f32.mrf.mxu1 }
 0x202   :  { %v351_v44 = vadd.f32 %v1369_v42, %v350_v43 }
 0x203   :  { %v1602_v45 = vpop.f32.mrf.mxu1 }
 0x204   :  { %v356_v46 = vmax.f32 %v351_v44, 0.0 }
 0x205   :  { %v353_v47 = vpop.f32.mrf.mxu1 }
 0x206   :  { %357 = vst [vmem:[#allocation17] sm:$0xff] %v356_v46  ;;  %v358_v5 = vpack.c.bf16 %v356_v46, %v356_v46 }
 0x207   :  { %v1603_v48 = vpop.f32.mrf.mxu1 }
 0x221   :  { %v1512_v50 = vpop.f32.mrf.mxu1 }
 0x223   :  { %v1513_v51 = vpop.f32.mrf.mxu1 }
 0x224   :  { %v1514_v53 = vadd.f32 %v1513_v51, %v1512_v50 }
 0x225   :  { %v1515_v54 = vpop.f32.mrf.mxu1 }
 0x226   :  { %v837_v55 = vadd.f32 %v1514_v53, %v797_v52 }
 0x227   :  { %v1516_v56 = vpop.f32.mrf.mxu1 }
 0x228   :  { %v877_v57 = vadd.f32 %v1536_v30, %v837_v55 }
 0x22a   :  { %v882_v58 = vmax.f32 %v877_v57, 0.0 }
 0x22c   :  { %v883_v60 = vpack.c.bf16 %v882_v58, %v882_v58 }
 0x22e   :  { %1621 = vmatmul.mubr.bf16.vlgmr.msra.gmra.mxu1 %v883_v60 }
 0x22f   :  { %1645 = vmatpush3.bf16.msra.mxu1 %v1765_v59  ;;  %1660 = vmatprep.mubr.msk.bf16.mxu1 %vm2035_vm0, %v2034_v0 }
 0x230   :  { %1646 = vmatprep.subr.bf16.mxu1 %v2034_v0 }
 0x233   :  { %1647 = vmatpush3.bf16.msra.mxu1 %v1766_v61 }
 0x234   :  { %1648 = vmatprep.subr.bf16.mxu1 %v2034_v0 }
 0x237   :  { %1649 = vmatpush3.bf16.msra.mxu1 %v1767_v62 }
 0x238   :  { %1650 = vmatprep.subr.bf16.mxu1 %v2034_v0 }
 0x23b   :  { %1651 = vmatpush3.bf16.msra.mxu1 %v1768_v63 }
 0x23c   :  { %1652 = vmatprep.subr.bf16.mxu1 %v2034_v0 }
 0x23f   :  { %1653 = vmatpush3.bf16.msra.mxu1 %v1769_v1 }
 0x240   :  { %1654 = vmatprep.subr.bf16.mxu1 %v2034_v0 }
 0x243   :  { %1655 = vmatpush3.bf16.msra.mxu1 %v1770_v2 }
 0x244   :  { %1656 = vmatprep.subr.bf16.mxu1 %v2034_v0 }
 0x247   :  { %1657 = vmatpush3.bf16.msra.mxu1 %v1771_v3 }
 0x248   :  { %1658 = vmatprep.subr.bf16.mxu1 %v2034_v0 }
 0x24b   :  { %1659 = vmatpush3.bf16.msra.mxu1 %v1772_v4 }
 0x24e   :  { %1661 = vmatmul.mubr.bf16.vlgmr.msra.gmra.mxu1 %v358_v5 }
 0x2ee   :  { %v989_v9 = vpop.f32.mrf.mxu1 }
 0x2ef   :  { %v990_v10 = vadd.f32 %v1427_v8, %v989_v9 }
 0x2f0   :  { %v1622_v11 = vpop.f32.mrf.mxu1 }
 0x2f1   :  { %v995_v12 = vmax.f32 %v990_v10, 0.0 }
 0x2f2   :  { %v992_v13 = vpop.f32.mrf.mxu1 }
 0x2f3   :  { %v997_v15 = vpack.c.bf16 %v995_v12, %v995_v12  ;;  %996 = vst [vmem:[#allocation18] sm:$0xff] %v995_v12 }
 0x2f4   :  { %v1623_v16 = vpop.f32.mrf.mxu1 }
 0x2f5   :  { %1641 = vmatmul.mubr.bf16.vlgmr.msra.gmra.mxu0 %v997_v15 }
 0x2f6   :  { %1665 = vmatpush3.bf16.msra.mxu0 %v1781_v14  ;;  %1680 = vmatprep.mubr.msk.bf16.mxu0 %vm2035_vm0, %v2034_v0 }
 0x2f7   :  { %1666 = vmatprep.subr.bf16.mxu0 %v2034_v0 }
 0x2fa   :  { %1667 = vmatpush3.bf16.msra.mxu0 %v1782_v17 }
 0x2fb   :  { %1668 = vmatprep.subr.bf16.mxu0 %v2034_v0 }
 0x2fe   :  { %1669 = vmatpush3.bf16.msra.mxu0 %v1783_v18 }
 0x2ff   :  { %1670 = vmatprep.subr.bf16.mxu0 %v2034_v0 }
 0x302   :  { %1671 = vmatpush3.bf16.msra.mxu0 %v1784_v19 }
 0x303   :  { %1672 = vmatprep.subr.bf16.mxu0 %v2034_v0 }
 0x306   :  { %1673 = vmatpush3.bf16.msra.mxu0 %v1785_v20 }
 0x307   :  { %1674 = vmatprep.subr.bf16.mxu0 %v2034_v0 }
 0x30a   :  { %1675 = vmatpush3.bf16.msra.mxu0 %v1786_v21 }
 0x30b   :  { %1676 = vmatprep.subr.bf16.mxu0 %v2034_v0 }
 0x30e   :  { %v1200_v22 = vpop.f32.mrf.mxu1  ;;  %1677 = vmatpush3.bf16.msra.mxu0 %v1787_v26 }
 0x30f   :  { %1678 = vmatprep.subr.bf16.mxu0 %v2034_v0 }
 0x310   :  { %v1662_v23 = vpop.f32.mrf.mxu1 }
 0x312   :  { %v1203_v24 = vpop.f32.mrf.mxu1  ;;  %1679 = vmatpush3.bf16.msra.mxu0 %v1788_v27 }
 0x314   :  { %v1663_v25 = vpop.f32.mrf.mxu1 }
 0x3b5   :  { %v1112_v28 = vpop.f32.mrf.mxu0 }
 0x3b6   :  { %v1201_v30 = vadd.f32 %v1200_v22, %v1112_v28 }
 0x3b7   :  { %v1642_v31 = vpop.f32.mrf.mxu0 }
 0x3b8   :  { %v1213_v32 = vadd.f32 %v1452_v29, %v1201_v30 }
 0x3b9   :  { %v1115_v33 = vpop.f32.mrf.mxu0 }
 0x3ba   :  { %v1214_v34 = vmax.f32 %v1213_v32, 0.0 }
 0x3bb   :  { %v1643_v35 = vpop.f32.mrf.mxu0 }
 0x3bc   :  { %v1215_v36 = vpack.c.bf16 %v1214_v34, %v1214_v34 }
 0x3be   :  { %1681 = vmatmul.mubr.bf16.vlgmr.msra.gmra.mxu0 %v1215_v36 }
 0x3bf   :  { %1980 = shalt.err (!%p1977_p7)
}
 0x3c0   :  { %1339 = dma.vmem_to_hbm [thread:$0]  %s1337_s11, 128, %s2273_s16, [#allocation4]  }
 0x3c1   :  { %s1989_s30 = scalar_lea.vmem %s1347_s29, 128  ;;  %p1994_p9 = scmp.lt.s32.totalorder %s1347_s29, %s1347_s29 }
 0x3c2   :  { %p1990_p8 = scmp.ne.s32.totalorder %s1347_s29, %s1989_s30  ;;  %p1995_p10 = scmp.lt.s32.totalorder %s1989_s30, %s1989_s30 }
 0x3c4   :  { %p1996_p11 = por %p1995_p10, %p1994_p9 }
 0x3c6   :  { %p1997_p12 = pnand %p1996_p11, %p1990_p8 }
 0x3c8   :  { %2000 = shalt.err (!%p1997_p12)
}
 0x3c9   :  { %1349 = dma.vmem_to_hbm [thread:$0]  %s1347_s29, 128, %s2274_s17, [#allocation19]   ;;  %v1453_v0 = vld [vmem:[%s2271_s14] ss:$0 sm:$0xff] }
 0x47e   :  { %v1321_v37 = vpop.f32.mrf.mxu0 }
 0x47f   :  { %v1322_v38 = vadd.f32 %v1453_v0, %v1321_v37 }
 0x480   :  { %v1682_v39 = vpop.f32.mrf.mxu0 }
 0x481   :  { %1327 = vst [vmem:[%s2272_s15] sm:$0xff] %v1322_v38 }
 0x482   :  { %v1324_v40 = vpop.f32.mrf.mxu0 }
 0x484   :  { %v1683_v41 = vpop.f32.mrf.mxu0 }
 0x485   :  { %2019 = dma.done.wait [#allocation4], 128  }
 0x486   :  { %2020 = vsyncadd [#allocation4], 4294967168 }
 0x487   :  { %2021 = dma.done.wait [#allocation19], 128  }
 0x488   :  { %2022 = vsyncadd [#allocation19], 4294967168 }
 0x489   :  { %1358 = vsyncpa [#allocation3], 1 }
 0x48a   :  { %1359 = vsyncpa [#allocation6], 1 }
 0x48b   :  { %1360 = vsyncpa [#allocation9], 1 }
 0x48c   :  { %1361 = vsyncpa [#allocation12], 1 }
 0x48d   :  { %1362 = vsyncpa [#allocation15], 1 }
 0x48e   :  { %1363 = vsyncpa [#allocation4], 1 }
 0x48f   :  { %1364 = vsyncpa [#allocation19], 1 }

</bundles_post_ra>
